<compile_context>
chip_gen: v6e
topology: v6e:2x2x1
jax: 0.10.0
libtpu: 0.0.40
codegen_flags: <defaults>
</compile_context>

<pallas_src>
import functools

import jax
import jax.numpy as jnp
from jax.experimental import pallas as pl
from jax.experimental.pallas import tpu as pltpu

LN_EPS = 1e-12  # BERT-style LayerNorm epsilon used by the original model


# --------------------------------------------------------------------------- #
# Kernel 1: LayerNorm pre-pass (NormalizeVideo; affine folded into the weights)
# --------------------------------------------------------------------------- #
def _ln_prepass_kernel(x_ref, o_ref):
    x = x_ref[...]                                        # (TM, Dv) f32
    mu = jnp.mean(x, axis=-1, keepdims=True)
    xc = x - mu
    var = jnp.mean(xc * xc, axis=-1, keepdims=True)
    o_ref[...] = (xc * jax.lax.rsqrt(var + LN_EPS)).astype(o_ref.dtype)


def _layernorm_prepass(video2, *, tm, out_dtype):
    n_pad, dv = video2.shape
    return pl.pallas_call(
        _ln_prepass_kernel,
        out_shape=jax.ShapeDtypeStruct((n_pad, dv), out_dtype),
        grid_spec=pltpu.PrefetchScalarGridSpec(
            num_scalar_prefetch=0,
            grid=(n_pad // tm,),
            in_specs=[pl.BlockSpec((tm, dv), lambda i: (i, 0))],
            out_specs=pl.BlockSpec((tm, dv), lambda i: (i, 0)),
        ),
        compiler_params=pltpu.CompilerParams(dimension_semantics=("parallel",)),
    )(video2)


# --------------------------------------------------------------------------- #
# Kernel 2: fused concat-Linear  out = xn @ Wv' + action @ Wa + bias'
# --------------------------------------------------------------------------- #
def _fused_lp_kernel(xn_ref, act_ref, wv_ref, wa_ref, bias_ref, out_ref, *,
                     bpt, fpt, global_action, tiles_per_batch):
    """One (vocab-tile j, row-tile i) block.

    xn_ref  : (TM, Dv)        bf16  normalized video rows (pre-pass output)
    act_ref : global: (B_pad, Da) bf16 full per-batch action matrix (resident)
              per-frame: (TM, Da)  bf16 per-row action features
    wv_ref  : (Dv, TN)        bf16  gamma-folded lp.weight.T (video rows)
    wa_ref  : (Da, TN)        bf16  lp.weight.T (action rows)
    bias_ref: (1, TN)         f32   lp.bias + beta @ Wv
    out_ref : (TM, TN)              TM = bpt * fpt rows, batch-aligned
    """
    acc = jnp.dot(xn_ref[...], wv_ref[...], preferred_element_type=jnp.float32)

    if global_action:
        i = pl.program_id(1)
        if tiles_per_batch == 1:
            start = pl.multiple_of(i * bpt, bpt)     # tile covers bpt whole batches
        else:
            start = i // tiles_per_batch             # bpt == 1: tile is inside one batch
        act = act_ref[pl.ds(start, bpt), :]          # (bpt, Da)
    else:
        act = act_ref[...]                           # (TM, Da), bpt == TM, fpt == 1

    # Per-batch action logits computed ONCE (not per frame): small-K MXU pass dedup.
    act_logits = jnp.dot(act, wa_ref[...], preferred_element_type=jnp.float32)
    act_logits = act_logits + bias_ref[...]          # (bpt, TN)

    if bpt == 1 or fpt == 1:
        acc = acc + act_logits                       # plain / lane-broadcast add
    else:
        tm, tn = acc.shape
        acc = acc.reshape(bpt, fpt, tn) + act_logits[:, None, :]
        acc = acc.reshape(tm, tn)
    out_ref[...] = acc.astype(out_ref.dtype)


# --------------------------------------------------------------------------- #
# Parameter preparation (hoist out of the per-call path and cache the result)
# --------------------------------------------------------------------------- #
def prepare_caption_params(params, *, vocab_tile=1024, matmul_dtype=jnp.bfloat16):
    """Fold LayerNorm affine + lp.bias into the weights, pad V, cast to matmul dtype."""
    assert vocab_tile % 128 == 0, "vocab tile must be a multiple of 128 (lane)"
    gamma = jnp.asarray(params["ln_gamma"], jnp.float32)            # (Dv,)
    beta = jnp.asarray(params["ln_beta"], jnp.float32)              # (Dv,)
    wv = jnp.asarray(params["lp_w_video"], jnp.float32)             # (Dv, V) = lp.weight.T[:Dv]
    wa = jnp.asarray(params["lp_w_action"], jnp.float32)            # (Da, V) = lp.weight.T[Dv:]
    bias = jnp.asarray(params["lp_bias"], jnp.float32)              # (V,)

    vocab = wv.shape[-1]
    v_pad = pl.cdiv(vocab, vocab_tile) * vocab_tile

    wv_folded = (wv * gamma[:, None]).astype(matmul_dtype)          # diag(gamma) @ Wv
    wa_cast = wa.astype(matmul_dtype)
    bias_folded = bias + beta @ wv                                  # (V,)

    if v_pad != vocab:
        wv_folded = jnp.pad(wv_folded, ((0, 0), (0, v_pad - vocab)))
        wa_cast = jnp.pad(wa_cast, ((0, 0), (0, v_pad - vocab)))
        bias_folded = jnp.pad(bias_folded, ((0, v_pad - vocab),))

    return {
        "wv": wv_folded,                       # (Dv, V_pad) matmul_dtype
        "wa": wa_cast,                         # (Da, V_pad) matmul_dtype
        "bias": bias_folded.reshape(1, v_pad),  # (1, V_pad) f32
        "vocab_size": vocab,
        "vocab_tile": vocab_tile,
        "matmul_dtype": matmul_dtype,
    }


# --------------------------------------------------------------------------- #
# Forward wrapper (mirrors CaptionGenerator.forward up to `video = self.lp(video)`)
# --------------------------------------------------------------------------- #
def caption_generator_forward(video, video_mask, action_input, params=None, *,
                              prepared_params=None,
                              action_feature_global=True,
                              row_tile=512, vocab_tile=1024,
                              matmul_dtype=jnp.bfloat16,
                              out_dtype=jnp.float32,
                              vmem_limit_bytes=None):
    """LN(video) fused with the concat + self.lp Linear.  Glue stays in JAX."""
    assert row_tile % 8 == 0, "row tile must be a multiple of 8 (sublane)"

    if prepared_params is None:
        prepared_params = prepare_caption_params(
            params, vocab_tile=vocab_tile, matmul_dtype=matmul_dtype)
    wv = prepared_params["wv"]
    wa = prepared_params["wa"]
    bias2 = prepared_params["bias"]
    vocab = prepared_params["vocab_size"]
    tn = prepared_params["vocab_tile"]
    matmul_dtype = prepared_params["matmul_dtype"]

    dv, v_pad = wv.shape
    da = wa.shape[0]

    # --- glue: torch .view(...) / .float() equivalents ----------------------
    video = jnp.asarray(video, jnp.float32)
    video = video.reshape(-1, video.shape[-2], video.shape[-1])      # (B, F, Dv)
    if video_mask is not None:
        video_mask = video_mask.reshape(-1, video_mask.shape[-1])    # (B, F) (unused here)
    bsz, frames, dv_in = video.shape
    assert dv_in == dv, (dv_in, dv)

    action_input = jnp.asarray(action_input, jnp.float32)
    assert action_input.shape[-1] == da, (action_input.shape, da)

    f8 = pl.cdiv(frames, 8) * 8   # frames padded to a sublane multiple

    # --- row tiling aligned to batch boundaries (enables action dedup) ------
    if action_feature_global:
        # torch: action_input.expand(-1, F, -1)  -> all frames of a batch share one row.
        act_rows = action_input.reshape(action_input.shape[0], da)   # (B, Da)
        if row_tile >= f8:
            f_pad = f8
            bpt = row_tile // f_pad                    # whole batches per row tile
            tm = bpt * f_pad
            fpt = f_pad
            tiles_per_batch = 1
        else:
            tm = row_tile
            f_pad = pl.cdiv(frames, tm) * tm           # whole row tiles per batch
            bpt = 1
            fpt = tm
            tiles_per_batch = f_pad // tm
        b_pad = pl.cdiv(bsz, bpt) * bpt
        n_pad = b_pad * f_pad

        if (b_pad, f_pad) != (bsz, frames):
            video = jnp.pad(video, ((0, b_pad - bsz), (0, f_pad - frames), (0, 0)))
        video2 = video.reshape(n_pad, dv)

        act2 = act_rows.astype(matmul_dtype)
        if b_pad != bsz:
            act2 = jnp.pad(act2, ((0, b_pad - bsz), (0, 0)))
        act_spec = pl.BlockSpec((b_pad, da), lambda j, i: (0, 0))    # whole array, resident
        act_blk_rows = b_pad
    else:
        # per-frame action features (B, F, Da): no dedup possible, stream per row.
        assert action_input.shape[1] == frames, action_input.shape
        tm = row_tile
        n = bsz * frames
        n_pad = pl.cdiv(n, tm) * tm
        bpt, fpt, tiles_per_batch = tm, 1, 1
        b_pad, f_pad = bsz, frames
        video2 = video.reshape(n, dv)
        act2 = action_input.reshape(n, da).astype(matmul_dtype)
        if n_pad != n:
            video2 = jnp.pad(video2, ((0, n_pad - n), (0, 0)))
            act2 = jnp.pad(act2, ((0, n_pad - n), (0, 0)))
        act_spec = pl.BlockSpec((tm, da), lambda j, i: (i, 0))
        act_blk_rows = tm

    # --- pass 1: LayerNorm once, write bf16 normalized video ----------------
    xn = _layernorm_prepass(video2, tm=tm, out_dtype=matmul_dtype)

    # --- pass 2: fused concat-Linear over a (vocab, rows) grid --------------
    n_row_tiles = n_pad // tm
    n_vocab_tiles = v_pad // tn
    grid = (n_vocab_tiles, n_row_tiles)

    if vmem_limit_bytes is None:
        # Rough double-buffered working set + f32 accumulator headroom.
        mm_b = jnp.zeros((), matmul_dtype).dtype.itemsize
        o_b = jnp.zeros((), out_dtype).dtype.itemsize
        blk = (tm * dv * mm_b + dv * tn * mm_b + da * tn * mm_b
               + act_blk_rows * da * mm_b + tn * 4 + tm * tn * o_b)
        # Clamp: >=32 MiB (v5e default is only 16 MiB), <=96 MiB (keep v7x in mind:
        # on v7x pick tiles so this stays well under its 64 MiB physical VMEM).
        vmem_limit_bytes = int(min(max(2 * blk + tm * tn * 4 + (2 << 20), 32 << 20),
                                   96 << 20))

    kernel = functools.partial(_fused_lp_kernel, bpt=bpt, fpt=fpt,
                               global_action=action_feature_global,
                               tiles_per_batch=tiles_per_batch)

    out = pl.pallas_call(
        kernel,
        out_shape=jax.ShapeDtypeStruct((n_pad, v_pad), out_dtype),
        grid_spec=pltpu.PrefetchScalarGridSpec(
            num_scalar_prefetch=0,
            grid=grid,
            in_specs=[
                pl.BlockSpec((tm, dv), lambda j, i: (i, 0)),   # normalized video rows
                act_spec,                                      # action (resident / per row)
                pl.BlockSpec((dv, tn), lambda j, i: (0, j)),   # Wv' (resident across i)
                pl.BlockSpec((da, tn), lambda j, i: (0, j)),   # Wa  (resident across i)
                pl.BlockSpec((1, tn), lambda j, i: (0, j)),    # folded bias
            ],
            out_specs=pl.BlockSpec((tm, tn), lambda j, i: (i, j)),
        ),
        compiler_params=pltpu.CompilerParams(
            dimension_semantics=("parallel", "parallel"),
            vmem_limit_bytes=vmem_limit_bytes),
    )(xn, act2, wv, wa, bias2)

    # Un-pad.  (When B, F and V are already tile-aligned this is a free reshape;
    # only padded shapes pay the slice pass.)
    if action_feature_global:
        out3 = out.reshape(b_pad, f_pad, v_pad)
        if (b_pad, f_pad, v_pad) != (bsz, frames, vocab):
            out3 = out3[:bsz, :frames, :vocab]
        projected_video = out3
    else:
        n = bsz * frames
        if (n_pad, v_pad) != (n, vocab):
            out = out[:n, :vocab]
        projected_video = out.reshape(bsz, frames, vocab)

    # TODO(synk): visual encoder (VisualModel), decoder (DecoderModel) and the
    # CrossEntropyLoss decoder loss are not provided in the excerpt and are not
    # reproduced here; this returns the `self.lp(...)` projection.
    return projected_video


# --------------------------------------------------------------------------- #
# Plain-JAX f32 reference (identical math to the torch module) for validation
# --------------------------------------------------------------------------- #
def _reference_forward(video, action_input, params, action_feature_global=True):
    video = jnp.asarray(video, jnp.float32)
    video = video.reshape(-1, video.shape[-2], video.shape[-1])
    bsz, frames, _ = video.shape
    action_input = jnp.asarray(action_input, jnp.float32)
    if action_feature_global:
        action_input = jnp.broadcast_to(
            action_input.reshape(bsz, 1, -1), (bsz, frames, action_input.shape[-1]))
    mu = jnp.mean(video, axis=-1, keepdims=True)
    var = jnp.mean((video - mu) ** 2, axis=-1, keepdims=True)
    vn = (video - mu) / jnp.sqrt(var + LN_EPS)
    vn = vn * params["ln_gamma"] + params["ln_beta"]
    cat = jnp.concatenate([vn, action_input], axis=2)
    w_full = jnp.concatenate([params["lp_w_video"], params["lp_w_action"]], axis=0)
    return cat @ w_full + params["lp_bias"]


if __name__ == "__main__":
    # Small shapes consistent with the module's forward():
    #   video: (B, F, video_dim), video_mask: (B, F), action_input: (B, 1, action_dim)
    #   custom_input_dim = video_dim + action_dim, lp output dim = vocab_size
    B, F, Dv, Da, V = 3, 16, 32, 16, 320

    key = jax.random.PRNGKey(0)
    ks = jax.random.split(key, 8)
    video = jax.random.normal(ks[0], (B, F, Dv), dtype=jnp.float32)
    video_mask = jnp.ones((B, F), dtype=jnp.int32)
    action_global = jax.random.normal(ks[1], (B, 1, Da), dtype=jnp.float32)
    action_frames = jax.random.normal(ks[2], (B, F, Da), dtype=jnp.float32)

    # Parameters stored as (in_features, out_features), i.e. lp.weight.T split into
    # video / action rows.
    params = {
        "ln_gamma": 1.0 + 0.1 * jax.random.normal(ks[3], (Dv,), dtype=jnp.float32),
        "ln_beta": 0.05 * jax.random.normal(ks[4], (Dv,), dtype=jnp.float32),
        "lp_w_video": 0.02 * jax.random.normal(ks[5], (Dv, V), dtype=jnp.float32),
        "lp_w_action": 0.02 * jax.random.normal(ks[6], (Da, V), dtype=jnp.float32),
        "lp_bias": 0.01 * jax.random.normal(ks[7], (V,), dtype=jnp.float32),
    }

    # Weight folding / padding / casts hoisted & reused across calls (per review).
    prep = prepare_caption_params(params, vocab_tile=128)

    ref_g = _reference_forward(video, action_global, params, action_feature_global=True)
    ref_f = _reference_forward(video, action_frames, params, action_feature_global=False)

    # (A) global action, several whole batches per row tile (bpt=2, fpt=16).
    out_a = caption_generator_forward(video, video_mask, action_global,
                                      prepared_params=prep, row_tile=32)
    # (B) global action, several row tiles per batch (bpt=1, tiles_per_batch=2).
    out_b = caption_generator_forward(video, video_mask, action_global,
                                      prepared_params=prep, row_tile=8)
    # (C) per-frame action features (action_feature_global=False).
    out_c = caption_generator_forward(video, video_mask, action_frames,
                                      prepared_params=prep, row_tile=16,
                                      action_feature_global=False)
    # (D) production defaults (row_tile=512, vocab_tile=1024), params folded in-call.
    out_d = caption_generator_forward(video, video_mask, action_global, params)

    for out in (out_a, out_b, out_c, out_d):
        jax.block_until_ready(out)
        assert out.shape == (B, F, V), out.shape

    for out, ref in ((out_a, ref_g), (out_b, ref_g), (out_c, ref_f), (out_d, ref_g)):
        max_err = float(jnp.max(jnp.abs(out - ref)))
        # bf16 matmul inputs vs f32 reference -> loose-but-tight-enough tolerance.
        assert max_err < 1e-2, max_err

    print("KERNEL_OK")
</pallas_src>

<mosaic_0001>
module attributes {stable_mosaic.version = 11 : i64} {
  func.func @_ln_prepass_kernel(%arg0: i32, %arg1: memref<32x32xf32, #tpu.memory_space<vmem>>, %arg2: memref<32x32xbf16, #tpu.memory_space<vmem>>) attributes {dimension_semantics = [#tpu.dimension_semantics<parallel>], iteration_bounds = array<i64: 2>, scalar_prefetch = 0 : i64, scratch_operands = 0 : i64, tpu.core_type = #tpu.core_type<tc>, window_params = [{transform_indices = @transform_0, window_bounds = array<i64: 32, 32>}, {transform_indices = @transform_1, window_bounds = array<i64: 32, 32>}]} {
    %c0 = arith.constant 0 : index
    %c0_0 = arith.constant 0 : index
    %0 = vector.load %arg1[%c0, %c0_0] : memref<32x32xf32, #tpu.memory_space<vmem>>, vector<32x32xf32>
    %cst = arith.constant dense<0.000000e+00> : vector<32xf32>
    %1 = vector.multi_reduction <add>, %0, %cst [1] : vector<32x32xf32> to vector<32xf32>
    %2 = vector.shape_cast %1 : vector<32xf32> to vector<32x1xf32>
    %cst_1 = arith.constant 3.200000e+01 : f32
    %3 = vector.broadcast %cst_1 : f32 to vector<32x1xf32>
    %4 = arith.divf %2, %3 : vector<32x1xf32>
    %5 = vector.broadcast %4 : vector<32x1xf32> to vector<32x32xf32>
    %6 = arith.subf %0, %5 : vector<32x32xf32>
    %7 = arith.mulf %6, %6 : vector<32x32xf32>
    %cst_2 = arith.constant dense<0.000000e+00> : vector<32xf32>
    %8 = vector.multi_reduction <add>, %7, %cst_2 [1] : vector<32x32xf32> to vector<32xf32>
    %9 = vector.shape_cast %8 : vector<32xf32> to vector<32x1xf32>
    %cst_3 = arith.constant 3.200000e+01 : f32
    %10 = vector.broadcast %cst_3 : f32 to vector<32x1xf32>
    %11 = arith.divf %9, %10 : vector<32x1xf32>
    %cst_4 = arith.constant 9.99999996E-13 : f32
    %12 = vector.broadcast %cst_4 : f32 to vector<32x1xf32>
    %13 = arith.addf %11, %12 : vector<32x1xf32>
    %14 = math.rsqrt %13 : vector<32x1xf32>
    %15 = vector.broadcast %14 : vector<32x1xf32> to vector<32x32xf32>
    %16 = arith.mulf %6, %15 : vector<32x32xf32>
    %17 = arith.truncf %16 : vector<32x32xf32> to vector<32x32xbf16>
    %c0_5 = arith.constant 0 : index
    %c0_6 = arith.constant 0 : index
    %18 = vector.load %arg2[%c0_5, %c0_6] : memref<32x32xbf16, #tpu.memory_space<vmem>>, vector<32x32xbf16>
    tpu.vector_store %arg2[%c0_5, %c0_6], %17 {strides = array<i32>} : memref<32x32xbf16, #tpu.memory_space<vmem>>, vector<32x32xbf16>,
    return
  }
  func.func @transform_0(%arg0: i32) -> (i32, i32) {
    %c0_i32 = arith.constant 0 : i32
    %c0_i32_0 = arith.constant 0 : i32
    return %arg0, %c0_i32 : i32, i32
  }
  func.func @transform_1(%arg0: i32) -> (i32, i32) {
    %c0_i32 = arith.constant 0 : i32
    %c0_i32_0 = arith.constant 0 : i32
    return %arg0, %c0_i32 : i32, i32
  }
}

</mosaic_0001>

<bundles_post_ra>
// kernel: tpu_custom_call.1
= control target key start
LH: loop header
LB: loop body
LE: loop exit
PB: predicated region body
PF: predicated region fallthrough
CT: control target
= control target key end

     0   :  { %s308_s6 = smov 0   ;;  %s337_s0 = inlined_call_operand.vmem [shape: f32[64,32], index: 0, kind: input, shape index: {}]   ;;  %s338_s1 = inlined_call_operand.vmem [shape: bf16[64,32], index: 1, kind: output, shape index: {}]  }
   0x1 LB: > { %s255_s7 = sadd.s32 4294967295, %s296_s6   ;;  %p259_p0 = scmp.ge.s32.totalorder %s296_s6, 1  ;;  %s296_s6 = sphi %s308_s6, %s11_s6  }
   0x2   : > { %p88_p1 = scmp.lt.s32.totalorder %s296_s6, 3 }
   0x4   : > { %p89_p2 = pnand %p259_p0, %p88_p1 }
   0x5   : > { %s260_s8 = sshll.u32 (!%p89_p2), %s255_s7, 2 }
   0x6   : > { %92 = sbr.rel (%p89_p2) target bundleno = 330 (0x14a), region = 24  ;;  %p109_p3 = scmp.lt.s32.totalorder (!%p89_p2), %s260_s8, 7 }
   0xb   : > { %s340_s8 = smov (!%p109_p3, %s260_s8), 7  ;;  %vm124_vm0 = vcmask 261120   ;;  %vm194_vm1 = vcmask 257024  }
   0xc   : > { %s261_s9 = sshll.u32 %s340_s8, 3  ;;  %s263_s13 = sshll.u32 %s340_s8, 2 }
   0xd   : > { %s112_s12 = scalar_lea.vmem %s337_s0, %s261_s9  ;;  %s118_s16 = scalar_lea.vmem %s338_s1, %s263_s13 }
   0xe   : > { %v120_v0 = vld [vmem:[%s112_s12] sm:$0xff]  ;;  %v122_v1 = vld [vmem:[%s112_s12 + $0x10] sm:$0xff]  ;;  %v121_v2 = vld [vmem:[%s112_s12 + $0x8] sm:$0xff] }
   0xf   : > { %v125_v3 = vsel %vm124_vm0, %v120_v0, 0.0  ;;  %v131_v4 = vsel %vm124_vm0, %v122_v1, 0.0  ;;  %v123_v5 = vld [vmem:[%s112_s12 + $0x18] sm:$0xff]  ;;  %v128_v6 = vsel %vm124_vm0, %v121_v2, 0.0 }
  0x10   : > { %126 = vadd.xlane.f32.xlu0 %v125_v3  ;;  %132 = vadd.xlane.f32.xlu1 %v131_v4  ;;  %v134_v7 = vsel %vm124_vm0, %v123_v5, 0.0 }
  0x14   : > { %129 = vadd.xlane.f32.xlu0 %v128_v6  ;;  %135 = vadd.xlane.f32.xlu1 %v134_v7 }
  0x99   : > { %v127_v8 = vpop.xlane.xlu0 %126  ;;  %v133_v9 = vpop.xlane.xlu1 %132 }
  0x9a   : > { %v138_v10 = vmul.f32 0.03125, %v127_v8  ;;  %v140_v11 = vmul.f32 0.03125, %v133_v9 }
  0x9c   : > { %v142_v12 = vsub.f32 %v120_v0, %v138_v10  ;;  %v144_v13 = vsub.f32 %v122_v1, %v140_v11 }
  0x9d   : > { %v130_v14 = vpop.xlane.xlu0 %129  ;;  %v136_v15 = vpop.xlane.xlu1 %135 }
  0x9e   : > { %v139_v16 = vmul.f32 0.03125, %v130_v14  ;;  %v141_v17 = vmul.f32 0.03125, %v136_v15  ;;  %v146_v18 = vmul.f32 %v142_v12, %v142_v12  ;;  %v148_v19 = vmul.f32 %v144_v13, %v144_v13 }
  0xa0   : > { %v143_v20 = vsub.f32 %v121_v2, %v139_v16  ;;  %v145_v21 = vsub.f32 %v123_v5, %v141_v17  ;;  %v150_v22 = vsel %vm124_vm0, %v146_v18, 0.0  ;;  %v156_v23 = vsel %vm124_vm0, %v148_v19, 0.0 }
  0xa1   : > { %151 = vadd.xlane.f32.xlu0 %v150_v22 }
  0xa2   : > { %v147_v24 = vmul.f32 %v143_v20, %v143_v20  ;;  %v149_v25 = vmul.f32 %v145_v21, %v145_v21 }
  0xa4   : > { %v153_v26 = vsel %vm124_vm0, %v147_v24, 0.0  ;;  %v159_v27 = vsel %vm124_vm0, %v149_v25, 0.0 }
  0xa5   : > { %157 = vadd.xlane.f32.xlu0 %v156_v23  ;;  %154 = vadd.xlane.f32.xlu1 %v153_v26 }
  0xa9   : > { %160 = vadd.xlane.f32.xlu1 %v159_v27 }
 0x12a   : > { %v152_v28 = vpop.xlane.xlu0 %151 }
 0x12b   : > { %v162_v29 = vmul.f32 0.03125, %v152_v28 }
 0x12d   : > { %v166_v30 = vadd.f32 1e-12, %v162_v29 }
 0x12e   : > { %v155_v31 = vpop.xlane.xlu1 %154  ;;  %v158_v32 = vpop.xlane.xlu0 %157 }
 0x12f   : > { %282 = vrsqrt.f32 %v166_v30  ;;  %v163_v33 = vmul.f32 0.03125, %v155_v31  ;;  %v164_v34 = vmul.f32 0.03125, %v158_v32 }
 0x131   : > { %v167_v35 = vadd.f32 1e-12, %v163_v33  ;;  %v168_v36 = vadd.f32 1e-12, %v164_v34 }
 0x132   : > { %v161_v37 = vpop.xlane.xlu1 %160 }
 0x133   : > { %284 = vrsqrt.f32 %v167_v35  ;;  %v165_v38 = vmul.f32 0.03125, %v161_v37 }
 0x134   : > { %286 = vrsqrt.f32 %v168_v36 }
 0x135   : > { %v169_v39 = vadd.f32 1e-12, %v165_v38 }
 0x137   : > { %288 = vrsqrt.f32 %v169_v39 }
 0x13c   : > { %v283_v40 = vpop.eup %282 }
 0x13d   : > { %v174_v41 = vmul.f32 %v283_v40, %v142_v12 }
 0x13f   : > { %v270_v42 = vpack.c.bf16 %v174_v41, %v174_v41 }
 0x140   : > { %v285_v43 = vpop.eup %284 }
 0x141   : > { %v287_v44 = vpop.eup %286  ;;  %195 = vst.msk [vmem:[%s118_s16] sm:$0xf] %vm194_vm1, %v270_v42  ;;  %v175_v45 = vmul.f32 %v285_v43, %v143_v20 }
 0x142   : > { %v176_v46 = vmul.f32 %v287_v44, %v144_v13 }
 0x143   : > { %v271_v47 = vpack.c.bf16 %v175_v45, %v175_v45 }
 0x144   : > { %v289_v48 = vpop.eup %288  ;;  %v272_v49 = vpack.c.bf16 %v176_v46, %v176_v46 }
 0x145   : > { %196 = vst.msk [vmem:[%s118_s16 + $0x4] sm:$0xf] %vm194_vm1, %v271_v47  ;;  %v177_v50 = vmul.f32 %v289_v48, %v145_v21 }
 0x146   : > { %197 = vst.msk [vmem:[%s118_s16 + $0x8] sm:$0xf] %vm194_vm1, %v272_v49 }
 0x147   : > { %v273_v51 = vpack.c.bf16 %v177_v50, %v177_v50 }
 0x149   : > { %198 = vst.msk [vmem:[%s118_s16 + $0xc] sm:$0xf] %vm194_vm1, %v273_v51 }
 0x14a PF: > { %s11_s6 = sadd.s32 1, %s296_s6  }
 0x14b   : > { %p8_p4 = scmp.ge.s32.totalorder %s11_s6, 4  }
 0x14d   :  { %10 = sbr.rel (!%p8_p4) target bundleno = 1 (0x1), region = 54 }

</bundles_post_ra>
